<compile_context>
chip_gen: v5e
topology: v5e:2x2
jax: 0.10.0
libtpu: 0.0.40
codegen_flags: <defaults>
</compile_context>

<pallas_src>
import jax
import jax.numpy as jnp
from jax.experimental import pallas as pl
from jax.experimental.pallas import tpu as pltpu

STATE_DIM = 8
HIDDEN = 50
ACTION_N = 4
LANE = 128
TINY_PATH_MAX_ROWS = 512  # route anything bigger through the gridded path


def _round_up(x, m):
    return (x + m - 1) // m * m


def cem_mlp_kernel(x_ref, w1_ref, b1_ref, w2_ref, b2_ref, o_ref):
    """Fused MLP: out = relu(x @ W1 + b1) @ W2 + b2.

    Weights are lane-padded (zero columns/rows) and stored bf16; matmuls run
    on the bf16 MXU path with f32 accumulation.  Only the first
    o_ref.shape[-1] (= action_n) logit columns are stored to the output.
    """
    x16 = x_ref[...].astype(jnp.bfloat16)
    h = jnp.dot(x16, w1_ref[...], preferred_element_type=jnp.float32)
    h = jnp.maximum(h + b1_ref[...], 0.0)
    out = (
        jnp.dot(h.astype(jnp.bfloat16), w2_ref[...],
                preferred_element_type=jnp.float32)
        + b2_ref[...]
    )
    # Store only the valid (unpadded) logit columns -> (B, action_n) output.
    o_ref[...] = out[:, : o_ref.shape[-1]].astype(o_ref.dtype)


def pad_params(w1, b1, w2, b2):
    """Pad hidden/action dims up to 128 lanes ONCE (call at init, not per step).

    Zero padding keeps logits[:, :action_n] unchanged: padded hidden units see
    zero weights/bias (relu(0)=0) and feed zero rows of W2.  Weights are cast
    to bf16 for the MXU; biases stay f32 (added to the f32 accumulator).
    """
    state_dim, hidden = w1.shape
    action_n = w2.shape[1]
    hp = _round_up(hidden, LANE)
    ap = _round_up(action_n, LANE)
    w1p = jnp.zeros((state_dim, hp), jnp.float32).at[:, :hidden].set(w1)
    b1p = jnp.zeros((1, hp), jnp.float32).at[0, :hidden].set(b1)
    w2p = jnp.zeros((hp, ap), jnp.float32).at[:hidden, :action_n].set(w2)
    b2p = jnp.zeros((1, ap), jnp.float32).at[0, :action_n].set(b2)
    return (
        w1p.astype(jnp.bfloat16),
        b1p,
        w2p.astype(jnp.bfloat16),
        b2p,
        action_n,
    )


def cem_forward(x, padded_params, *, block_rows=4096):
    """x: [B, state_dim] f32; padded_params: output of pad_params().
    Returns logits [B, action_n] f32."""
    w1p, b1p, w2p, b2p, action_n = padded_params
    B, state_dim = x.shape
    hp, ap = w1p.shape[1], w2p.shape[1]

    if B <= TINY_PATH_MAX_ROWS:
        # --- Tiny-batch path (get_action): single block, no grid/pipeline. ---
        vmem_spec = pl.BlockSpec(memory_space=pltpu.MemorySpace.VMEM)
        return pl.pallas_call(
            cem_mlp_kernel,
            out_shape=jax.ShapeDtypeStruct((B, action_n), jnp.float32),
            in_specs=[vmem_spec] * 5,
            out_specs=vmem_spec,
        )(x, w1p, b1p, w2p, b2p)

    # --- Batched path (CEM population evaluation): tile over rows only. ---
    # Cap the tile at ceil(B/2) (8-aligned) so the grid always has >= 2 steps
    # and both v7x TensorCores participate via dimension_semantics="parallel".
    rows_half = _round_up(-(-B // 2), 8)
    br = min(block_rows, rows_half)
    bp = _round_up(B, br)
    xp = x if bp == B else jnp.zeros((bp, state_dim), x.dtype).at[:B].set(x)

    out = pl.pallas_call(
        cem_mlp_kernel,
        out_shape=jax.ShapeDtypeStruct((bp, action_n), jnp.float32),
        grid=(bp // br,),
        in_specs=[
            pl.BlockSpec((br, state_dim), lambda i: (i, 0)),
            pl.BlockSpec((state_dim, hp), lambda i: (0, 0)),  # weights resident
            pl.BlockSpec((1, hp), lambda i: (0, 0)),
            pl.BlockSpec((hp, ap), lambda i: (0, 0)),
            pl.BlockSpec((1, ap), lambda i: (0, 0)),
        ],
        # Output block last dim == full array dim (action_n), so only the 4
        # valid columns are ever written back to HBM.
        out_specs=pl.BlockSpec((br, action_n), lambda i: (i, 0)),
        compiler_params=pltpu.CompilerParams(
            dimension_semantics=("parallel",),
            vmem_limit_bytes=48 * 1024 * 1024,  # headroom for big row tiles on v7x
        ),
    )(xp, w1p, b1p, w2p, b2p)
    return out[:B] if bp != B else out


def init_params(key, state_dim, hidden, action_n):
    """Deterministic params mirroring the PyTorch init scheme:
       kaiming_normal_(weight, nonlinearity='relu'), default Linear bias init."""
    k1, k2, k3, k4 = jax.random.split(key, 4)

    # Kaiming normal (fan_in, gain=sqrt(2)); PyTorch weight shape is [out, in].
    std1 = jnp.sqrt(2.0 / state_dim)
    w1_torch = jax.random.normal(k1, (hidden, state_dim), jnp.float32) * std1
    std2 = jnp.sqrt(2.0 / hidden)
    w2_torch = jax.random.normal(k2, (action_n, hidden), jnp.float32) * std2

    # PyTorch Linear bias default: U(-1/sqrt(fan_in), 1/sqrt(fan_in)).
    bnd1 = 1.0 / jnp.sqrt(state_dim)
    b1 = jax.random.uniform(k3, (hidden,), jnp.float32, -bnd1, bnd1)
    bnd2 = 1.0 / jnp.sqrt(hidden)
    b2 = jax.random.uniform(k4, (action_n,), jnp.float32, -bnd2, bnd2)

    # Pre-transpose weights to [in, out] for the kernel.
    return w1_torch.T, b1, w2_torch.T, b2


if __name__ == "__main__":
    key = jax.random.PRNGKey(0)
    kx, kb, kp = jax.random.split(key, 3)
    w1, b1, w2, b2 = init_params(kp, STATE_DIM, HIDDEN, ACTION_N)

    # Pad (and bf16-cast) the parameters ONCE, outside the forward path.
    padded = pad_params(w1, b1, w2, b2)

    def ref(x):  # f32 reference
        return jnp.maximum(x @ w1 + b1, 0.0) @ w2 + b2

    # bf16 matmul inputs -> relaxed tolerances vs. the f32 reference.
    ATOL = RTOL = 5e-2

    # 1) Tiny-batch path (no grid): per-step get_action style inference.
    x_small = jax.random.normal(kx, (16, STATE_DIM), jnp.float32)
    logits_small = cem_forward(x_small, padded)
    jax.block_until_ready(logits_small)
    assert logits_small.shape == (16, ACTION_N)
    assert jnp.allclose(logits_small, ref(x_small), atol=ATOL, rtol=RTOL)

    # 2) Batched path (grid over rows, weights VMEM-resident, >= 2 grid steps).
    x_big = jax.random.normal(kb, (600, STATE_DIM), jnp.float32)
    logits_big = cem_forward(x_big, padded)
    jax.block_until_ready(logits_big)
    assert logits_big.shape == (600, ACTION_N)
    assert jnp.allclose(logits_big, ref(x_big), atol=ATOL, rtol=RTOL)

    # TODO(synk): get_action's softmax sampling and update_policy's Adam/CE
    # training loop are host-side logic, not part of the forward-pass kernel.
    print("KERNEL_OK")
</pallas_src>

<mosaic_0001>
module attributes {stable_mosaic.version = 11 : i64} {
  func.func @cem_mlp_kernel(%arg0: memref<16x8xf32, #tpu.memory_space<vmem>>, %arg1: memref<8x128xbf16, #tpu.memory_space<vmem>>, %arg2: memref<1x128xf32, #tpu.memory_space<vmem>>, %arg3: memref<128x128xbf16, #tpu.memory_space<vmem>>, %arg4: memref<1x128xf32, #tpu.memory_space<vmem>>, %arg5: memref<16x4xf32, #tpu.memory_space<vmem>>) attributes {dimension_semantics = [], scalar_prefetch = 0 : i64, scratch_operands = 0 : i64, tpu.core_type = #tpu.core_type<tc>} {
    %c0 = arith.constant 0 : index
    %c0_0 = arith.constant 0 : index
    %0 = vector.load %arg0[%c0, %c0_0] : memref<16x8xf32, #tpu.memory_space<vmem>>, vector<16x8xf32>
    %1 = arith.truncf %0 : vector<16x8xf32> to vector<16x8xbf16>
    %c0_1 = arith.constant 0 : index
    %c0_2 = arith.constant 0 : index
    %2 = vector.load %arg1[%c0_1, %c0_2] : memref<8x128xbf16, #tpu.memory_space<vmem>>, vector<8x128xbf16>
    %cst = arith.constant dense<0.000000e+00> : vector<16x128xf32>
    %3 = tpu.matmul %1, %2, %cst {dimension_numbers = #tpu.dot_dimension_numbers<[1], [0], [0], [1], [0, 0, 1, 1], [], []>} : vector<16x8xbf16>, vector<8x128xbf16>, vector<16x128xf32> -> vector<16x128xf32>
    %c0_3 = arith.constant 0 : index
    %c0_4 = arith.constant 0 : index
    %4 = vector.load %arg2[%c0_3, %c0_4] : memref<1x128xf32, #tpu.memory_space<vmem>>, vector<1x128xf32>
    %5 = vector.broadcast %4 : vector<1x128xf32> to vector<16x128xf32>
    %6 = arith.addf %3, %5 : vector<16x128xf32>
    %cst_5 = arith.constant 0.000000e+00 : f32
    %7 = vector.broadcast %cst_5 : f32 to vector<16x128xf32>
    %8 = arith.maximumf %6, %7 : vector<16x128xf32>
    %9 = arith.truncf %8 : vector<16x128xf32> to vector<16x128xbf16>
    %c0_6 = arith.constant 0 : index
    %c0_7 = arith.constant 0 : index
    %10 = vector.load %arg3[%c0_6, %c0_7] : memref<128x128xbf16, #tpu.memory_space<vmem>>, vector<128x128xbf16>
    %cst_8 = arith.constant dense<0.000000e+00> : vector<16x128xf32>
    %11 = tpu.matmul %9, %10, %cst_8 {dimension_numbers = #tpu.dot_dimension_numbers<[1], [0], [0], [1], [0, 0, 1, 1], [], []>} : vector<16x128xbf16>, vector<128x128xbf16>, vector<16x128xf32> -> vector<16x128xf32>
    %c0_9 = arith.constant 0 : index
    %c0_10 = arith.constant 0 : index
    %12 = vector.load %arg4[%c0_9, %c0_10] : memref<1x128xf32, #tpu.memory_space<vmem>>, vector<1x128xf32>
    %13 = vector.broadcast %12 : vector<1x128xf32> to vector<16x128xf32>
    %14 = arith.addf %11, %13 : vector<16x128xf32>
    %15 = vector.extract_strided_slice %14 {offsets = [0, 0], sizes = [16, 4], strides = [1, 1]} : vector<16x128xf32> to vector<16x4xf32>
    %c0_11 = arith.constant 0 : index
    %c0_12 = arith.constant 0 : index
    %16 = vector.load %arg5[%c0_11, %c0_12] : memref<16x4xf32, #tpu.memory_space<vmem>>, vector<16x4xf32>
    tpu.vector_store %arg5[%c0_11, %c0_12], %15 {strides = array<i32>} : memref<16x4xf32, #tpu.memory_space<vmem>>, vector<16x4xf32>,
    return
  }
}

</mosaic_0001>

<bundles_post_ra>
// kernel: tpu_custom_call.1
= control target key start
LH: loop header
LB: loop body
LE: loop exit
PB: predicated region body
PF: predicated region fallthrough
CT: control target
= control target key end

     0   :  { %10 = vsyncpa [#allocation3], 0  ;;  %s232_s21 = smov [#allocation2]   ;;  %s233_s23 = smov 64   ;;  %s289_s0 = inlined_call_operand.vmem [shape: f32[16,8], index: 0, kind: input, shape index: {}]   ;;  %s290_s1 = inlined_call_operand.vmem [shape: bf16[8,128], index: 1, kind: input, shape index: {}]   ;;  %s291_s2 = inlined_call_operand.vmem [shape: f32[1,128], index: 2, kind: input, shape index: {}]   ;;  %s292_s3 = inlined_call_operand.hbm [shape: bf16[128,128], index: 3, kind: input, shape index: {}]   ;;  %s293_s4 = inlined_call_operand.vmem [shape: f32[1,128], index: 4, kind: input, shape index: {}]   ;;  %s294_s5 = inlined_call_operand.vmem [shape: f32[16,4], index: 5, kind: output, shape index: {}]  }
   0x1   :  { %s21_s20 = sshll.u32 %s292_s3, 4  ;;  %s23_s22 = sshll.u32 %s232_s21, 4  ;;  %s22_s20 = int_to_ptr.hbm [resolvable:$true] %s21_s20  ;;  %s24_s22 = int_to_ptr.vmem [resolvable:$true] %s23_s22 }
   0x2   :  { %s234_s24 = smov 4  }
   0x3   :  { %29 = dma.hbm_to_vmem [thread:$0]  %s22_s20, 1024, %s24_s22, [#allocation3], %s233_s23, %s233_s23, %s234_s24  }
   0x4   :  { %230 = dma.done.wait [#allocation3], 1024  }
   0x5   :  { %231 = vsyncadd [#allocation3], 4294966272  ;;  %vm49_vm0 = vcmask 1043456   ;;  %v40_v0 = vld [vmem:[%s290_s1] sm:$0xf]  ;;  %v38_v2 = vld [vmem:[%s289_s0 + $0x8] sm:$0xff] }
   0x6   :  { %v37_v1 = vld [vmem:[%s289_s0] sm:$0xff]  ;;  %v51_v3 = vsel %vm49_vm0, %v40_v0, 0  ;;  %v200_v5 = vld [vmem:[#allocation2 + $0x38] sm:$0xff]  ;;  %vm45_vm1 = vcmask 64512   ;;  %v199_v6 = vld [vmem:[#allocation2 + $0x30] sm:$0xff]  ;;  %vm152_vm2 = vcmask 31744  }
   0x7   :  { %v39_v4 = vpack.c.bf16 %v38_v2, %v37_v1  ;;  %60 = vmatpush.bf16.msra.mxu0 %v51_v3  ;;  %138 = vmatpush.bf16.msra.mxu1 %v200_v5  ;;  %v198_v7 = vld [vmem:[#allocation2 + $0x28] sm:$0xff]  ;;  %v197_v8 = vld [vmem:[#allocation2 + $0x20] sm:$0xff]  ;;  %v196_v9 = vld [vmem:[#allocation2 + $0x18] sm:$0xff] }
   0x8   :  { %v195_v10 = vld [vmem:[#allocation2 + $0x10] sm:$0xff]  ;;  %v194_v11 = vld [vmem:[#allocation2 + $0x8] sm:$0xff]  ;;  %v193_v12 = vld [vmem:[#allocation2] sm:$0xff] }
   0x9   :  { %v204_v14 = vld [vmem:[%s291_s2] ss:$0 sm:$0xff] }
   0xa   :  { %160 = vmatmul.msk.bf16.vlgmr.msra.gmra.mxu0 %vm45_vm1, %v39_v4  ;;  %v205_v21 = vld [vmem:[%s293_s4] ss:$0 sm:$0xff] }
   0xb   :  { %139 = vmatpush.bf16.msra.mxu1 %v199_v6 }
   0xf   :  { %140 = vmatpush.bf16.msra.mxu1 %v198_v7 }
  0x13   :  { %141 = vmatpush.bf16.msra.mxu1 %v197_v8 }
  0x17   :  { %142 = vmatpush.bf16.msra.mxu1 %v196_v9 }
  0x1b   :  { %143 = vmatpush.bf16.msra.mxu1 %v195_v10 }
  0x1f   :  { %144 = vmatpush.bf16.msra.mxu1 %v194_v11 }
  0x23   :  { %145 = vmatpush.bf16.msra.mxu1 %v193_v12 }
  0x87   :  { %v62_v13 = vpop.f32.mrf.mxu0 }
  0x88   :  { %v63_v15 = vadd.f32 %v204_v14, %v62_v13 }
  0x8a   :  { %v67_v18 = vmax.f32 %v63_v15, 0.0 }
  0x8f   :  { %v64_v16 = vpop.f32.mrf.mxu0 }
  0x90   :  { %v65_v17 = vadd.f32 %v204_v14, %v64_v16 }
  0x92   :  { %v68_v19 = vmax.f32 %v65_v17, 0.0 }
  0x94   :  { %v69_v20 = vpack.c.bf16 %v68_v19, %v67_v18 }
  0x96   :  { %146 = vmatmul.bf16.vlgmr.msra.gmra.mxu1 %v69_v20 }
 0x113   :  { %v147_v22 = vpop.f32.mrf.mxu1 }
 0x114   :  { %v148_v23 = vadd.f32 %v205_v21, %v147_v22 }
 0x116   :  { %153 = vst.msk [vmem:[%s294_s5] sm:$0xff] %vm152_vm2, %v148_v23 }
 0x11b   :  { %v149_v24 = vpop.f32.mrf.mxu1 }
 0x11c   :  { %v150_v25 = vadd.f32 %v205_v21, %v149_v24 }
 0x11e   :  { %154 = vst.msk [vmem:[%s294_s5 + $0x8] sm:$0xff] %vm152_vm2, %v150_v25 }
 0x11f   :  { %159 = vsyncpa [#allocation3], 1 }

</bundles_post_ra>
